<compile_context>
chip_gen: v5e
topology: v5e:2x2
jax: 0.10.0
libtpu: 0.0.40
codegen_flags: <defaults>
</compile_context>

<pallas_src>
import functools

import jax
import jax.numpy as jnp
from jax.experimental import pallas as pl
from jax.experimental.pallas import tpu as pltpu


MXU_INPUT_DTYPE = jnp.bfloat16   # bf16 MXU inputs, f32 accumulation
_LANE = 128                      # lane width / MXU-friendly multiple
_ROW_ALIGN = 16                  # sublane alignment safe for bf16 and f32 blocks
_MAX_TILE_M = 512                # rows per grid step


# ----------------------------- PyTorch helper ------------------------------ #
def conv_same_padding(in_size, kernel, stride=1, dilation=1):
    effective_filter_size = (kernel - 1) * dilation + 1
    out_size = (in_size + stride - 1) // stride
    padding_needed = max(0, (out_size - 1) * stride + effective_filter_size - in_size)
    if padding_needed % 2 == 0:
        return padding_needed // 2, padding_needed // 2
    return (padding_needed - 1) // 2, (padding_needed + 1) // 2


def _ceil_to(x, m):
    return ((x + m - 1) // m) * m


# ------------------------------ Pallas kernel ------------------------------ #
def _conv_affine_kernel(p_ref, w_ref, shift_ref, o_ref, *, relu):
    # (TILE_M, Kp) @ (Kp, Cp) on the MXU with f32 accumulation.  The BatchNorm
    # scale (and conv bias) are folded into w / shift in the wrapper, so the
    # epilogue is a single per-channel add (+ optional ReLU) in f32.
    z = jnp.dot(p_ref[...], w_ref[...], preferred_element_type=jnp.float32)
    z = z + shift_ref[...]
    if relu:
        z = jnp.maximum(z, 0.0)
    o_ref[...] = z.astype(o_ref.dtype)


def _run_conv_pallas(patches, w2d_scaled, shift, *, relu, out_dtype=jnp.float32):
    """conv-as-matmul with fused affine/ReLU epilogue, tiled over the M rows."""
    M, K = patches.shape
    Cout = w2d_scaled.shape[1]

    # MXU / lane-dense padding: K, Cout -> multiples of 128; M -> multiple of
    # the (16-aligned) row tile.  Zero padding is exact: padded K rows carry
    # zero weights, padded output rows/cols are sliced off afterwards.
    Kp = _ceil_to(K, _LANE)
    Cp = _ceil_to(Cout, _LANE)
    tile_m = min(_MAX_TILE_M, _ceil_to(M, _ROW_ALIGN))
    Mp = _ceil_to(M, tile_m)

    patches_p = jnp.pad(patches.astype(MXU_INPUT_DTYPE), ((0, Mp - M), (0, Kp - K)))
    w_p = jnp.pad(w2d_scaled.astype(MXU_INPUT_DTYPE), ((0, Kp - K), (0, Cp - Cout)))
    shift_p = jnp.pad(shift.reshape(1, Cout).astype(jnp.float32),
                      ((0, 0), (0, Cp - Cout)))

    # TODO(synk): for very large K add a K grid axis ("arbitrary", last) with a
    # VMEM accumulator + pl.when init/finalize instead of one wide weight block.
    out_p = pl.pallas_call(
        functools.partial(_conv_affine_kernel, relu=relu),
        out_shape=jax.ShapeDtypeStruct((Mp, Cp), out_dtype),
        grid=(Mp // tile_m,),
        in_specs=[
            pl.BlockSpec((tile_m, Kp), lambda i: (i, 0)),   # patch row tile
            pl.BlockSpec((Kp, Cp), lambda i: (0, 0)),       # full (scaled) weight
            pl.BlockSpec((1, Cp), lambda i: (0, 0)),        # per-channel shift
        ],
        out_specs=pl.BlockSpec((tile_m, Cp), lambda i: (i, 0)),
        compiler_params=pltpu.CompilerParams(
            dimension_semantics=("parallel",),      # megacore sharding on v7x
            vmem_limit_bytes=48 * 1024 * 1024,      # fits v7x's 64 MiB VMEM
        ),
    )(patches_p, w_p, shift_p)
    return out_p[:M, :Cout]


# ------------------------------ JAX glue (im2col) --------------------------- #
def _pad_same(x_nhwc, ksize, stride):
    _, H, W, _ = x_nhwc.shape
    pw0, pw1 = conv_same_padding(W, ksize, stride)   # ZeroPad2d width pads
    ph0, ph1 = conv_same_padding(H, ksize, stride)   # ZeroPad2d height pads
    return jnp.pad(x_nhwc, ((0, 0), (ph0, ph1), (pw0, pw1), (0, 0)))


def _im2col(xp, ksize, stride):
    # TODO(synk): build the patch tile from a VMEM-resident, halo-loaded input
    # strip inside the kernel (9 shifted matmuls) instead of materializing the
    # 9x-expanded patch matrix in HBM; kept in XLA at these small shapes.
    N, H, W, C = xp.shape
    Hout = (H - ksize) // stride + 1
    Wout = (W - ksize) // stride + 1
    cols = []
    for i in range(ksize):
        for j in range(ksize):
            cols.append(xp[:, i:i + stride * Hout:stride, j:j + stride * Wout:stride, :])
    patches = jnp.stack(cols, axis=3).reshape(N, Hout, Wout, ksize * ksize * C)
    return patches.reshape(N * Hout * Wout, ksize * ksize * C), N, Hout, Wout


def _fold_bn(w_oihw, bias, bn, eps=1e-5):
    """Fold conv bias + eval-mode BatchNorm into (scaled weight, shift)."""
    gamma, beta, mean, var = bn
    Cout = w_oihw.shape[0]
    # PyTorch weight (Cout, Cin, KH, KW) -> (KH*KW*Cin, Cout), matching patch order
    w2d = jnp.transpose(w_oihw, (2, 3, 1, 0)).reshape(-1, Cout)
    scale = gamma / jnp.sqrt(var + eps)
    shift = beta - mean * scale + bias * scale   # conv bias folded into affine shift
    return w2d * scale[None, :], shift


def stacked_resnet_block(x_nchw, params, eps=1e-5):
    """Forward pass of StackedResnetBlock (stack=1, res_block=0)."""
    x = jnp.transpose(x_nchw, (0, 2, 3, 1)).astype(jnp.float32)     # NCHW -> NHWC
    Cout = params["w1"].shape[0]

    # ---- res1: pad -> 3x3 stride-2 conv -> BN -> ReLU (bf16 intermediate) ----
    w1s, s1 = _fold_bn(params["w1"], params["b1"], params["bn1"], eps)
    p1, N, Ho, Wo = _im2col(_pad_same(x, 3, 2), 3, 2)
    y2d = _run_conv_pallas(p1, w1s, s1, relu=True, out_dtype=MXU_INPUT_DTYPE)
    y = y2d.reshape(N, Ho, Wo, Cout)

    # ---- fused res2 (3x3 s1 on y) + res3 (1x1 s2 projection on x) + ReLU ----
    # Single MXU matmul: [p2 | p3] @ [[w2]; [w3]] + (shift2 + shift3), ReLU.
    w2s, s2 = _fold_bn(params["w2"], params["b2"], params["bn2"], eps)
    w3s, s3 = _fold_bn(params["w3"], params["b3"], params["bn3"], eps)
    p2, _, _, _ = _im2col(_pad_same(y, 3, 1), 3, 1)                  # (M, 9*Cout) bf16
    p3, _, _, _ = _im2col(_pad_same(x, 1, 2), 1, 2)                  # (M, Cin)    f32
    p_cat = jnp.concatenate([p2, p3.astype(MXU_INPUT_DTYPE)], axis=1)
    w_cat = jnp.concatenate([w2s, w3s], axis=0)
    out2d = _run_conv_pallas(p_cat, w_cat, s2 + s3, relu=True, out_dtype=jnp.float32)

    out = out2d.reshape(N, Ho, Wo, Cout)
    return jnp.transpose(out, (0, 3, 1, 2))                          # NHWC -> NCHW


# ------------------------------- Param init --------------------------------- #
def init_params(key, cin, cout):
    keys = jax.random.split(key, 16)

    def bn(k):
        k0, k1, k2, k3 = jax.random.split(k, 4)
        gamma = 1.0 + 0.1 * jax.random.normal(k0, (cout,), jnp.float32)
        beta = 0.1 * jax.random.normal(k1, (cout,), jnp.float32)
        mean = 0.1 * jax.random.normal(k2, (cout,), jnp.float32)
        var = jax.random.uniform(k3, (cout,), jnp.float32, 0.5, 1.5)
        return (gamma, beta, mean, var)

    return {
        "w1": 0.1 * jax.random.normal(keys[0], (cout, cin, 3, 3), jnp.float32),
        "b1": 0.05 * jax.random.normal(keys[1], (cout,), jnp.float32),
        "bn1": bn(keys[2]),
        "w2": 0.1 * jax.random.normal(keys[3], (cout, cout, 3, 3), jnp.float32),
        "b2": 0.05 * jax.random.normal(keys[4], (cout,), jnp.float32),
        "bn2": bn(keys[5]),
        "w3": 0.1 * jax.random.normal(keys[6], (cout, cin, 1, 1), jnp.float32),
        "b3": 0.05 * jax.random.normal(keys[7], (cout,), jnp.float32),
        "bn3": bn(keys[8]),
    }


if __name__ == "__main__":
    key = jax.random.PRNGKey(0)
    kx, kp = jax.random.split(key)

    batch, input_num_filters, num_filters, input_size = 2, 4, 8, 16
    x = jax.random.normal(kx, (batch, input_num_filters, input_size, input_size),
                          jnp.float32)
    params = init_params(kp, input_num_filters, num_filters)

    out = jax.jit(stacked_resnet_block)(x, params)
    out = jax.block_until_ready(out)

    assert out.shape == (batch, num_filters, input_size // 2, input_size // 2)
    assert bool(jnp.all(jnp.isfinite(out)))
    assert bool(jnp.all(out >= 0.0))  # final ReLU
    print("KERNEL_OK")
</pallas_src>

<mosaic_0001>
module attributes {stable_mosaic.version = 11 : i64} {
  func.func @_conv_affine_kernel(%arg0: i32, %arg1: memref<128x128xbf16, #tpu.memory_space<vmem>>, %arg2: memref<128x128xbf16, #tpu.memory_space<vmem>>, %arg3: memref<1x128xf32, #tpu.memory_space<vmem>>, %arg4: memref<128x128xbf16, #tpu.memory_space<vmem>>) attributes {dimension_semantics = [#tpu.dimension_semantics<parallel>], iteration_bounds = array<i64: 1>, scalar_prefetch = 0 : i64, scratch_operands = 0 : i64, tpu.core_type = #tpu.core_type<tc>, window_params = [{transform_indices = @transform_0, window_bounds = array<i64: 128, 128>}, {pipeline_mode = #tpu.pipeline_mode<synchronous>, transform_indices = @transform_1, window_bounds = array<i64: 128, 128>}, {pipeline_mode = #tpu.pipeline_mode<synchronous>, transform_indices = @transform_2, window_bounds = array<i64: 1, 128>}, {transform_indices = @transform_3, window_bounds = array<i64: 128, 128>}]} {
    %c0 = arith.constant 0 : index
    %c0_0 = arith.constant 0 : index
    %0 = vector.load %arg1[%c0, %c0_0] : memref<128x128xbf16, #tpu.memory_space<vmem>>, vector<128x128xbf16>
    %c0_1 = arith.constant 0 : index
    %c0_2 = arith.constant 0 : index
    %1 = vector.load %arg2[%c0_1, %c0_2] : memref<128x128xbf16, #tpu.memory_space<vmem>>, vector<128x128xbf16>
    %cst = arith.constant dense<0.000000e+00> : vector<128x128xf32>
    %2 = tpu.matmul %0, %1, %cst {dimension_numbers = #tpu.dot_dimension_numbers<[1], [0], [0], [1], [0, 0, 1, 1], [], []>} : vector<128x128xbf16>, vector<128x128xbf16>, vector<128x128xf32> -> vector<128x128xf32>
    %c0_3 = arith.constant 0 : index
    %c0_4 = arith.constant 0 : index
    %3 = vector.load %arg3[%c0_3, %c0_4] : memref<1x128xf32, #tpu.memory_space<vmem>>, vector<1x128xf32>
    %4 = vector.broadcast %3 : vector<1x128xf32> to vector<128x128xf32>
    %5 = arith.addf %2, %4 : vector<128x128xf32>
    %cst_5 = arith.constant 0.000000e+00 : f32
    %6 = vector.broadcast %cst_5 : f32 to vector<128x128xf32>
    %7 = arith.maximumf %5, %6 : vector<128x128xf32>
    %8 = arith.truncf %7 : vector<128x128xf32> to vector<128x128xbf16>
    %c0_6 = arith.constant 0 : index
    %c0_7 = arith.constant 0 : index
    %9 = vector.load %arg4[%c0_6, %c0_7] : memref<128x128xbf16, #tpu.memory_space<vmem>>, vector<128x128xbf16>
    tpu.vector_store %arg4[%c0_6, %c0_7], %8 {strides = array<i32>} : memref<128x128xbf16, #tpu.memory_space<vmem>>, vector<128x128xbf16>,
    return
  }
  func.func @transform_0(%arg0: i32) -> (i32, i32) {
    %c0_i32 = arith.constant 0 : i32
    %c0_i32_0 = arith.constant 0 : i32
    return %arg0, %c0_i32 : i32, i32
  }
  func.func @transform_1(%arg0: i32) -> (i32, i32) {
    %c0_i32 = arith.constant 0 : i32
    %c0_i32_0 = arith.constant 0 : i32
    %c0_i32_1 = arith.constant 0 : i32
    return %c0_i32, %c0_i32_0 : i32, i32
  }
  func.func @transform_2(%arg0: i32) -> (i32, i32) {
    %c0_i32 = arith.constant 0 : i32
    %c0_i32_0 = arith.constant 0 : i32
    %c0_i32_1 = arith.constant 0 : i32
    return %c0_i32, %c0_i32_0 : i32, i32
  }
  func.func @transform_3(%arg0: i32) -> (i32, i32) {
    %c0_i32 = arith.constant 0 : i32
    %c0_i32_0 = arith.constant 0 : i32
    return %arg0, %c0_i32 : i32, i32
  }
}

module attributes {stable_mosaic.version = 11 : i64} {
  func.func @_conv_affine_kernel(%arg0: i32, %arg1: memref<128x128xbf16, #tpu.memory_space<vmem>>, %arg2: memref<128x128xbf16, #tpu.memory_space<vmem>>, %arg3: memref<1x128xf32, #tpu.memory_space<vmem>>, %arg4: memref<128x128xf32, #tpu.memory_space<vmem>>) attributes {dimension_semantics = [#tpu.dimension_semantics<parallel>], iteration_bounds = array<i64: 1>, scalar_prefetch = 0 : i64, scratch_operands = 0 : i64, tpu.core_type = #tpu.core_type<tc>, window_params = [{transform_indices = @transform_0, window_bounds = array<i64: 128, 128>}, {pipeline_mode = #tpu.pipeline_mode<synchronous>, transform_indices = @transform_1, window_bounds = array<i64: 128, 128>}, {pipeline_mode = #tpu.pipeline_mode<synchronous>, transform_indices = @transform_2, window_bounds = array<i64: 1, 128>}, {transform_indices = @transform_3, window_bounds = array<i64: 128, 128>}]} {
    %c0 = arith.constant 0 : index
    %c0_0 = arith.constant 0 : index
    %0 = vector.load %arg1[%c0, %c0_0] : memref<128x128xbf16, #tpu.memory_space<vmem>>, vector<128x128xbf16>
    %c0_1 = arith.constant 0 : index
    %c0_2 = arith.constant 0 : index
    %1 = vector.load %arg2[%c0_1, %c0_2] : memref<128x128xbf16, #tpu.memory_space<vmem>>, vector<128x128xbf16>
    %cst = arith.constant dense<0.000000e+00> : vector<128x128xf32>
    %2 = tpu.matmul %0, %1, %cst {dimension_numbers = #tpu.dot_dimension_numbers<[1], [0], [0], [1], [0, 0, 1, 1], [], []>} : vector<128x128xbf16>, vector<128x128xbf16>, vector<128x128xf32> -> vector<128x128xf32>
    %c0_3 = arith.constant 0 : index
    %c0_4 = arith.constant 0 : index
    %3 = vector.load %arg3[%c0_3, %c0_4] : memref<1x128xf32, #tpu.memory_space<vmem>>, vector<1x128xf32>
    %4 = vector.broadcast %3 : vector<1x128xf32> to vector<128x128xf32>
    %5 = arith.addf %2, %4 : vector<128x128xf32>
    %cst_5 = arith.constant 0.000000e+00 : f32
    %6 = vector.broadcast %cst_5 : f32 to vector<128x128xf32>
    %7 = arith.maximumf %5, %6 : vector<128x128xf32>
    %c0_6 = arith.constant 0 : index
    %c0_7 = arith.constant 0 : index
    %8 = vector.load %arg4[%c0_6, %c0_7] : memref<128x128xf32, #tpu.memory_space<vmem>>, vector<128x128xf32>
    tpu.vector_store %arg4[%c0_6, %c0_7], %7 {strides = array<i32>} : memref<128x128xf32, #tpu.memory_space<vmem>>, vector<128x128xf32>,
    return
  }
  func.func @transform_0(%arg0: i32) -> (i32, i32) {
    %c0_i32 = arith.constant 0 : i32
    %c0_i32_0 = arith.constant 0 : i32
    return %arg0, %c0_i32 : i32, i32
  }
  func.func @transform_1(%arg0: i32) -> (i32, i32) {
    %c0_i32 = arith.constant 0 : i32
    %c0_i32_0 = arith.constant 0 : i32
    %c0_i32_1 = arith.constant 0 : i32
    return %c0_i32, %c0_i32_0 : i32, i32
  }
  func.func @transform_2(%arg0: i32) -> (i32, i32) {
    %c0_i32 = arith.constant 0 : i32
    %c0_i32_0 = arith.constant 0 : i32
    %c0_i32_1 = arith.constant 0 : i32
    return %c0_i32, %c0_i32_0 : i32, i32
  }
  func.func @transform_3(%arg0: i32) -> (i32, i32) {
    %c0_i32 = arith.constant 0 : i32
    %c0_i32_0 = arith.constant 0 : i32
    return %arg0, %c0_i32 : i32, i32
  }
}

</mosaic_0001>

<bundles_post_ra>
// kernel: stacked_resnet_block.2
= control target key start
LH: loop header
LB: loop body
LE: loop exit
PB: predicated region body
PF: predicated region fallthrough
CT: control target
= control target key end

     0   :  { %s494_s1 = inlined_call_operand.vmem [shape: bf16[128,128], index: 1, kind: input, shape index: {}]   ;;  %s495_s2 = inlined_call_operand.vmem [shape: f32[1,128], index: 2, kind: input, shape index: {}]   ;;  %s496_s0 = inlined_call_operand.vmem [shape: bf16[128,128], index: 0, kind: input, shape index: {}]   ;;  %s497_s3 = inlined_call_operand.vmem [shape: bf16[128,128], index: 3, kind: output, shape index: {}]  }
   0x1   :  { %v326_v0 = vld [vmem:[%s494_s1 + $0x38] sm:$0xff]  ;;  %v325_v1 = vld [vmem:[%s494_s1 + $0x30] sm:$0xff]  ;;  %v324_v2 = vld [vmem:[%s494_s1 + $0x28] sm:$0xff] }
   0x2   :  { %146 = vmatpush.bf16.msra.mxu0 %v326_v0  ;;  %374 = vmatpush.bf16.msra.mxu1 %v326_v0  ;;  %v323_v3 = vld [vmem:[%s494_s1 + $0x20] sm:$0xff]  ;;  %v322_v4 = vld [vmem:[%s494_s1 + $0x18] sm:$0xff]  ;;  %v321_v5 = vld [vmem:[%s494_s1 + $0x10] sm:$0xff] }
   0x3   :  { %375 = vmatpush.bf16.msra.mxu2 %v326_v0  ;;  %376 = vmatpush.bf16.msra.mxu3 %v326_v0  ;;  %v320_v6 = vld [vmem:[%s494_s1 + $0x8] sm:$0xff]  ;;  %v319_v7 = vld [vmem:[%s494_s1] sm:$0xff]  ;;  %v313_v9 = vld [vmem:[%s496_s0 + $0x10] sm:$0xff] }
   0x4   :  { %v311_v8 = vld [vmem:[%s496_s0] sm:$0xff]  ;;  %v317_v11 = vld [vmem:[%s496_s0 + $0x30] sm:$0xff]  ;;  %v312_v12 = vld [vmem:[%s496_s0 + $0x8] sm:$0xff] }
   0x5   :  { %v315_v10 = vld [vmem:[%s496_s0 + $0x20] sm:$0xff]  ;;  %v314_v13 = vld [vmem:[%s496_s0 + $0x18] sm:$0xff]  ;;  %v316_v14 = vld [vmem:[%s496_s0 + $0x28] sm:$0xff] }
   0x6   :  { %147 = vmatpush.bf16.msra.mxu0 %v325_v1  ;;  %377 = vmatpush.bf16.msra.mxu1 %v325_v1  ;;  %v318_v15 = vld [vmem:[%s496_s0 + $0x38] sm:$0xff]  ;;  %v398_v18 = vld [vmem:[%s495_s2] ss:$0 sm:$0xff] }
   0x7   :  { %378 = vmatpush.bf16.msra.mxu2 %v325_v1  ;;  %379 = vmatpush.bf16.msra.mxu3 %v325_v1 }
   0xa   :  { %148 = vmatpush.bf16.msra.mxu0 %v324_v2  ;;  %380 = vmatpush.bf16.msra.mxu1 %v324_v2 }
   0xb   :  { %381 = vmatpush.bf16.msra.mxu2 %v324_v2  ;;  %382 = vmatpush.bf16.msra.mxu3 %v324_v2 }
   0xe   :  { %149 = vmatpush.bf16.msra.mxu0 %v323_v3  ;;  %383 = vmatpush.bf16.msra.mxu1 %v323_v3 }
   0xf   :  { %384 = vmatpush.bf16.msra.mxu2 %v323_v3  ;;  %385 = vmatpush.bf16.msra.mxu3 %v323_v3 }
  0x12   :  { %150 = vmatpush.bf16.msra.mxu0 %v322_v4  ;;  %386 = vmatpush.bf16.msra.mxu1 %v322_v4 }
  0x13   :  { %387 = vmatpush.bf16.msra.mxu2 %v322_v4  ;;  %388 = vmatpush.bf16.msra.mxu3 %v322_v4 }
  0x16   :  { %151 = vmatpush.bf16.msra.mxu0 %v321_v5  ;;  %389 = vmatpush.bf16.msra.mxu1 %v321_v5 }
  0x17   :  { %390 = vmatpush.bf16.msra.mxu2 %v321_v5  ;;  %391 = vmatpush.bf16.msra.mxu3 %v321_v5 }
  0x1a   :  { %152 = vmatpush.bf16.msra.mxu0 %v320_v6  ;;  %392 = vmatpush.bf16.msra.mxu1 %v320_v6 }
  0x1b   :  { %393 = vmatpush.bf16.msra.mxu2 %v320_v6  ;;  %394 = vmatpush.bf16.msra.mxu3 %v320_v6 }
  0x1e   :  { %153 = vmatpush.bf16.msra.mxu0 %v319_v7  ;;  %395 = vmatpush.bf16.msra.mxu1 %v319_v7 }
  0x1f   :  { %396 = vmatpush.bf16.msra.mxu2 %v319_v7  ;;  %397 = vmatpush.bf16.msra.mxu3 %v319_v7 }
  0x21   :  { %154 = vmatmul.bf16.vlgmr.msra.gmra.mxu0 %v311_v8  ;;  %164 = vmatmul.bf16.vlgmr.msra.gmra.mxu1 %v313_v9 }
  0x22   :  { %174 = vmatmul.bf16.vlgmr.msra.gmra.mxu2 %v315_v10  ;;  %184 = vmatmul.bf16.vlgmr.msra.gmra.mxu3 %v317_v11 }
  0x31   :  { %159 = vmatmul.bf16.gmra.mxu0 %v312_v12  ;;  %169 = vmatmul.bf16.gmra.mxu1 %v314_v13 }
  0x32   :  { %179 = vmatmul.bf16.gmra.mxu2 %v316_v14  ;;  %189 = vmatmul.bf16.gmra.mxu3 %v318_v15 }
  0x9e   :  { %v155_v16 = vpop.f32.mrf.mxu0  ;;  %v165_v17 = vpop.f32.mrf.mxu1 }
  0x9f   :  { %v156_v19 = vadd.f32 %v398_v18, %v155_v16  ;;  %v166_v20 = vadd.f32 %v398_v18, %v165_v17 }
  0xa1   :  { %v195_v27 = vmax.f32 %v156_v19, 0.0  ;;  %v199_v28 = vmax.f32 %v166_v20, 0.0 }
  0xa5   :  { %v175_v21 = vpop.f32.mrf.mxu2  ;;  %v185_v22 = vpop.f32.mrf.mxu3 }
  0xa6   :  { %v157_v23 = vpop.f32.mrf.mxu0  ;;  %v167_v24 = vpop.f32.mrf.mxu1  ;;  %v176_v33 = vadd.f32 %v398_v18, %v175_v21  ;;  %v186_v34 = vadd.f32 %v398_v18, %v185_v22 }
  0xa7   :  { %v158_v25 = vadd.f32 %v398_v18, %v157_v23  ;;  %v168_v26 = vadd.f32 %v398_v18, %v167_v24 }
  0xa8   :  { %v203_v41 = vmax.f32 %v176_v33, 0.0  ;;  %v207_v42 = vmax.f32 %v186_v34, 0.0 }
  0xa9   :  { %v196_v29 = vmax.f32 %v158_v25, 0.0  ;;  %v200_v30 = vmax.f32 %v168_v26, 0.0 }
  0xab   :  { %v330_v31 = vpack.c.bf16 %v196_v29, %v195_v27  ;;  %v340_v32 = vpack.c.bf16 %v200_v30, %v199_v28 }
  0xad   :  { %331 = vst [vmem:[%s497_s3] sm:$0xff] %v330_v31   ;;  %v177_v35 = vpop.f32.mrf.mxu2  ;;  %v187_v36 = vpop.f32.mrf.mxu3 }
  0xae   :  { %368 = vst [vmem:[%s497_s3 + $0x10] sm:$0xff] %v340_v32   ;;  %v178_v37 = vadd.f32 %v398_v18, %v177_v35  ;;  %v188_v38 = vadd.f32 %v398_v18, %v187_v36  ;;  %v160_v39 = vpop.f32.mrf.mxu0  ;;  %v170_v40 = vpop.f32.mrf.mxu1 }
  0xaf   :  { %v161_v47 = vadd.f32 %v398_v18, %v160_v39  ;;  %v171_v48 = vadd.f32 %v398_v18, %v170_v40 }
  0xb0   :  { %v204_v43 = vmax.f32 %v178_v37, 0.0  ;;  %v208_v44 = vmax.f32 %v188_v38, 0.0 }
  0xb1   :  { %v197_v55 = vmax.f32 %v161_v47, 0.0  ;;  %v201_v56 = vmax.f32 %v171_v48, 0.0 }
  0xb2   :  { %v350_v45 = vpack.c.bf16 %v204_v43, %v203_v41  ;;  %v360_v46 = vpack.c.bf16 %v208_v44, %v207_v42 }
  0xb4   :  { %370 = vst [vmem:[%s497_s3 + $0x20] sm:$0xff] %v350_v45  }
  0xb5   :  { %372 = vst [vmem:[%s497_s3 + $0x30] sm:$0xff] %v360_v46   ;;  %v180_v49 = vpop.f32.mrf.mxu2  ;;  %v190_v50 = vpop.f32.mrf.mxu3 }
  0xb6   :  { %v162_v51 = vpop.f32.mrf.mxu0  ;;  %v172_v52 = vpop.f32.mrf.mxu1  ;;  %v181_v61 = vadd.f32 %v398_v18, %v180_v49  ;;  %v191_v62 = vadd.f32 %v398_v18, %v190_v50 }
  0xb7   :  { %v163_v53 = vadd.f32 %v398_v18, %v162_v51  ;;  %v173_v54 = vadd.f32 %v398_v18, %v172_v52 }
  0xb8   :  { %v205_v3 = vmax.f32 %v181_v61, 0.0  ;;  %v209_v4 = vmax.f32 %v191_v62, 0.0 }
  0xb9   :  { %v198_v57 = vmax.f32 %v163_v53, 0.0  ;;  %v202_v58 = vmax.f32 %v173_v54, 0.0 }
  0xbb   :  { %v335_v59 = vpack.c.bf16 %v198_v57, %v197_v55  ;;  %v345_v60 = vpack.c.bf16 %v202_v58, %v201_v56 }
  0xbd   :  { %367 = vst [vmem:[%s497_s3 + $0x8] sm:$0xff] %v335_v59   ;;  %v182_v63 = vpop.f32.mrf.mxu2  ;;  %v192_v0 = vpop.f32.mrf.mxu3 }
  0xbe   :  { %369 = vst [vmem:[%s497_s3 + $0x18] sm:$0xff] %v345_v60   ;;  %v183_v1 = vadd.f32 %v398_v18, %v182_v63  ;;  %v193_v2 = vadd.f32 %v398_v18, %v192_v0 }
  0xc0   :  { %v206_v5 = vmax.f32 %v183_v1, 0.0  ;;  %v210_v6 = vmax.f32 %v193_v2, 0.0 }
  0xc2   :  { %v355_v7 = vpack.c.bf16 %v206_v5, %v205_v3  ;;  %v365_v8 = vpack.c.bf16 %v210_v6, %v209_v4 }
  0xc4   :  { %371 = vst [vmem:[%s497_s3 + $0x28] sm:$0xff] %v355_v7  }
  0xc5   :  { %373 = vst [vmem:[%s497_s3 + $0x38] sm:$0xff] %v365_v8  }

// kernel: stacked_resnet_block.3
= control target key start
LH: loop header
LB: loop body
LE: loop exit
PB: predicated region body
PF: predicated region fallthrough
CT: control target
= control target key end

     0   :  { %s455_s1 = inlined_call_operand.vmem [shape: bf16[128,128], index: 1, kind: input, shape index: {}]   ;;  %s456_s2 = inlined_call_operand.vmem [shape: f32[1,128], index: 2, kind: input, shape index: {}]   ;;  %s457_s0 = inlined_call_operand.vmem [shape: bf16[128,128], index: 0, kind: input, shape index: {}]   ;;  %s458_s3 = inlined_call_operand.vmem [shape: f32[128,128], index: 3, kind: output, shape index: {}]  }
   0x1   :  { %v310_v0 = vld [vmem:[%s455_s1 + $0x38] sm:$0xff]  ;;  %v309_v1 = vld [vmem:[%s455_s1 + $0x30] sm:$0xff]  ;;  %v308_v2 = vld [vmem:[%s455_s1 + $0x28] sm:$0xff] }
   0x2   :  { %146 = vmatpush.bf16.msra.mxu0 %v310_v0  ;;  %311 = vmatpush.bf16.msra.mxu1 %v310_v0  ;;  %v307_v3 = vld [vmem:[%s455_s1 + $0x20] sm:$0xff]  ;;  %v306_v4 = vld [vmem:[%s455_s1 + $0x18] sm:$0xff]  ;;  %v305_v5 = vld [vmem:[%s455_s1 + $0x10] sm:$0xff] }
   0x3   :  { %312 = vmatpush.bf16.msra.mxu2 %v310_v0  ;;  %313 = vmatpush.bf16.msra.mxu3 %v310_v0  ;;  %v304_v6 = vld [vmem:[%s455_s1 + $0x8] sm:$0xff]  ;;  %v303_v7 = vld [vmem:[%s455_s1] sm:$0xff]  ;;  %v297_v9 = vld [vmem:[%s457_s0 + $0x10] sm:$0xff] }
   0x4   :  { %v295_v8 = vld [vmem:[%s457_s0] sm:$0xff]  ;;  %v301_v11 = vld [vmem:[%s457_s0 + $0x30] sm:$0xff]  ;;  %v296_v12 = vld [vmem:[%s457_s0 + $0x8] sm:$0xff] }
   0x5   :  { %v299_v10 = vld [vmem:[%s457_s0 + $0x20] sm:$0xff]  ;;  %v298_v13 = vld [vmem:[%s457_s0 + $0x18] sm:$0xff]  ;;  %v300_v14 = vld [vmem:[%s457_s0 + $0x28] sm:$0xff] }
   0x6   :  { %147 = vmatpush.bf16.msra.mxu0 %v309_v1  ;;  %314 = vmatpush.bf16.msra.mxu1 %v309_v1  ;;  %v302_v15 = vld [vmem:[%s457_s0 + $0x38] sm:$0xff]  ;;  %v335_v16 = vld [vmem:[%s456_s2] ss:$0 sm:$0xff] }
   0x7   :  { %315 = vmatpush.bf16.msra.mxu2 %v309_v1  ;;  %316 = vmatpush.bf16.msra.mxu3 %v309_v1 }
   0xa   :  { %148 = vmatpush.bf16.msra.mxu0 %v308_v2  ;;  %317 = vmatpush.bf16.msra.mxu1 %v308_v2 }
   0xb   :  { %318 = vmatpush.bf16.msra.mxu2 %v308_v2  ;;  %319 = vmatpush.bf16.msra.mxu3 %v308_v2 }
   0xe   :  { %149 = vmatpush.bf16.msra.mxu0 %v307_v3  ;;  %320 = vmatpush.bf16.msra.mxu1 %v307_v3 }
   0xf   :  { %321 = vmatpush.bf16.msra.mxu2 %v307_v3  ;;  %322 = vmatpush.bf16.msra.mxu3 %v307_v3 }
  0x12   :  { %150 = vmatpush.bf16.msra.mxu0 %v306_v4  ;;  %323 = vmatpush.bf16.msra.mxu1 %v306_v4 }
  0x13   :  { %324 = vmatpush.bf16.msra.mxu2 %v306_v4  ;;  %325 = vmatpush.bf16.msra.mxu3 %v306_v4 }
  0x16   :  { %151 = vmatpush.bf16.msra.mxu0 %v305_v5  ;;  %326 = vmatpush.bf16.msra.mxu1 %v305_v5 }
  0x17   :  { %327 = vmatpush.bf16.msra.mxu2 %v305_v5  ;;  %328 = vmatpush.bf16.msra.mxu3 %v305_v5 }
  0x1a   :  { %152 = vmatpush.bf16.msra.mxu0 %v304_v6  ;;  %329 = vmatpush.bf16.msra.mxu1 %v304_v6 }
  0x1b   :  { %330 = vmatpush.bf16.msra.mxu2 %v304_v6  ;;  %331 = vmatpush.bf16.msra.mxu3 %v304_v6 }
  0x1e   :  { %153 = vmatpush.bf16.msra.mxu0 %v303_v7  ;;  %332 = vmatpush.bf16.msra.mxu1 %v303_v7 }
  0x1f   :  { %333 = vmatpush.bf16.msra.mxu2 %v303_v7  ;;  %334 = vmatpush.bf16.msra.mxu3 %v303_v7 }
  0x21   :  { %154 = vmatmul.bf16.vlgmr.msra.gmra.mxu0 %v295_v8  ;;  %164 = vmatmul.bf16.vlgmr.msra.gmra.mxu1 %v297_v9 }
  0x22   :  { %174 = vmatmul.bf16.vlgmr.msra.gmra.mxu2 %v299_v10  ;;  %184 = vmatmul.bf16.vlgmr.msra.gmra.mxu3 %v301_v11 }
  0x31   :  { %159 = vmatmul.bf16.gmra.mxu0 %v296_v12  ;;  %169 = vmatmul.bf16.gmra.mxu1 %v298_v13 }
  0x32   :  { %179 = vmatmul.bf16.gmra.mxu2 %v300_v14  ;;  %189 = vmatmul.bf16.gmra.mxu3 %v302_v15 }
  0x9e   :  { %v155_v17 = vpop.f32.mrf.mxu0  ;;  %v165_v18 = vpop.f32.mrf.mxu1 }
  0x9f   :  { %v156_v19 = vadd.f32 %v335_v16, %v155_v17  ;;  %v166_v20 = vadd.f32 %v335_v16, %v165_v18 }
  0xa1   :  { %v195_v21 = vmax.f32 %v156_v19, 0.0  ;;  %v199_v22 = vmax.f32 %v166_v20, 0.0 }
  0xa3   :  { %211 = vst [vmem:[%s458_s3] sm:$0xff] %v195_v21 }
  0xa4   :  { %215 = vst [vmem:[%s458_s3 + $0x20] sm:$0xff] %v199_v22 }
  0xa5   :  { %v175_v23 = vpop.f32.mrf.mxu2  ;;  %v185_v24 = vpop.f32.mrf.mxu3 }
  0xa6   :  { %v176_v25 = vadd.f32 %v335_v16, %v175_v23  ;;  %v186_v26 = vadd.f32 %v335_v16, %v185_v24  ;;  %v157_v27 = vpop.f32.mrf.mxu0  ;;  %v167_v28 = vpop.f32.mrf.mxu1 }
  0xa7   :  { %v158_v29 = vadd.f32 %v335_v16, %v157_v27  ;;  %v168_v30 = vadd.f32 %v335_v16, %v167_v28 }
  0xa8   :  { %v203_v31 = vmax.f32 %v176_v25, 0.0  ;;  %v207_v32 = vmax.f32 %v186_v26, 0.0 }
  0xa9   :  { %v196_v33 = vmax.f32 %v158_v29, 0.0  ;;  %v200_v34 = vmax.f32 %v168_v30, 0.0 }
  0xaa   :  { %219 = vst [vmem:[%s458_s3 + $0x40] sm:$0xff] %v203_v31 }
  0xab   :  { %223 = vst [vmem:[%s458_s3 + $0x60] sm:$0xff] %v207_v32 }
  0xac   :  { %212 = vst [vmem:[%s458_s3 + $0x8] sm:$0xff] %v196_v33 }
  0xad   :  { %216 = vst [vmem:[%s458_s3 + $0x28] sm:$0xff] %v200_v34  ;;  %v177_v35 = vpop.f32.mrf.mxu2  ;;  %v187_v36 = vpop.f32.mrf.mxu3 }
  0xae   :  { %v178_v37 = vadd.f32 %v335_v16, %v177_v35  ;;  %v188_v38 = vadd.f32 %v335_v16, %v187_v36  ;;  %v160_v39 = vpop.f32.mrf.mxu0  ;;  %v170_v40 = vpop.f32.mrf.mxu1 }
  0xaf   :  { %v161_v41 = vadd.f32 %v335_v16, %v160_v39  ;;  %v171_v42 = vadd.f32 %v335_v16, %v170_v40 }
  0xb0   :  { %v204_v43 = vmax.f32 %v178_v37, 0.0  ;;  %v208_v44 = vmax.f32 %v188_v38, 0.0 }
  0xb1   :  { %v197_v45 = vmax.f32 %v161_v41, 0.0  ;;  %v201_v46 = vmax.f32 %v171_v42, 0.0 }
  0xb2   :  { %220 = vst [vmem:[%s458_s3 + $0x48] sm:$0xff] %v204_v43 }
  0xb3   :  { %224 = vst [vmem:[%s458_s3 + $0x68] sm:$0xff] %v208_v44 }
  0xb4   :  { %213 = vst [vmem:[%s458_s3 + $0x10] sm:$0xff] %v197_v45 }
  0xb5   :  { %217 = vst [vmem:[%s458_s3 + $0x30] sm:$0xff] %v201_v46  ;;  %v180_v47 = vpop.f32.mrf.mxu2  ;;  %v190_v48 = vpop.f32.mrf.mxu3 }
  0xb6   :  { %v181_v49 = vadd.f32 %v335_v16, %v180_v47  ;;  %v191_v50 = vadd.f32 %v335_v16, %v190_v48  ;;  %v162_v51 = vpop.f32.mrf.mxu0  ;;  %v172_v52 = vpop.f32.mrf.mxu1 }
  0xb7   :  { %v163_v53 = vadd.f32 %v335_v16, %v162_v51  ;;  %v173_v54 = vadd.f32 %v335_v16, %v172_v52 }
  0xb8   :  { %v205_v55 = vmax.f32 %v181_v49, 0.0  ;;  %v209_v56 = vmax.f32 %v191_v50, 0.0 }
  0xb9   :  { %v198_v57 = vmax.f32 %v163_v53, 0.0  ;;  %v202_v58 = vmax.f32 %v173_v54, 0.0 }
  0xba   :  { %221 = vst [vmem:[%s458_s3 + $0x50] sm:$0xff] %v205_v55 }
  0xbb   :  { %225 = vst [vmem:[%s458_s3 + $0x70] sm:$0xff] %v209_v56 }
  0xbc   :  { %214 = vst [vmem:[%s458_s3 + $0x18] sm:$0xff] %v198_v57 }
  0xbd   :  { %218 = vst [vmem:[%s458_s3 + $0x38] sm:$0xff] %v202_v58  ;;  %v182_v59 = vpop.f32.mrf.mxu2  ;;  %v192_v60 = vpop.f32.mrf.mxu3 }
  0xbe   :  { %v183_v61 = vadd.f32 %v335_v16, %v182_v59  ;;  %v193_v62 = vadd.f32 %v335_v16, %v192_v60 }
  0xc0   :  { %v206_v63 = vmax.f32 %v183_v61, 0.0  ;;  %v210_v0 = vmax.f32 %v193_v62, 0.0 }
  0xc2   :  { %222 = vst [vmem:[%s458_s3 + $0x58] sm:$0xff] %v206_v63 }
  0xc3   :  { %226 = vst [vmem:[%s458_s3 + $0x78] sm:$0xff] %v210_v0 }

</bundles_post_ra>
